<compile_context>
chip_gen: v6e
topology: v6e:2x2x1
jax: 0.10.0
libtpu: 0.0.40
codegen_flags: <defaults>
</compile_context>

<pallas_src>
from typing import NamedTuple, Optional

import jax
import jax.numpy as jnp
from jax.experimental import pallas as pl
from jax.experimental.pallas import tpu as pltpu


def _round_up(v: int, m: int) -> int:
    return (v + m - 1) // m * m


def _pick_tn(N: int, tn_max: int = 512):
    """Lane-dense output tile: multiple of 128 that divides the padded N."""
    Np = _round_up(N, 128)
    if Np <= tn_max:
        return Np, Np                      # whole (padded) N in one tile
    for cand in (512, 256, 128):           # prefer 256-multiples (256x256 MXU on v6e/v7x)
        if cand <= tn_max and Np % cand == 0:
            return cand, Np
    return 128, Np


def _pick_tk(K: int, tk_max: int = 2048):
    """Reduction tile: single full-K pass if it fits, else minimize K padding."""
    Kp = _round_up(K, 128)
    if Kp <= tk_max:
        return Kp, Kp                      # one K step: no accumulator RMW across steps
    cands = list(range(256, tk_max + 1, 256)) or [128]
    best_tk, best_waste = None, None
    for tk in cands:                       # ascending: ties resolve to the larger tk
        waste = _round_up(K, tk) - K
        if best_waste is None or waste <= best_waste:
            best_tk, best_waste = tk, waste
    return best_tk, _round_up(K, best_tk)


class LinearParams(NamedTuple):
    wt: jax.Array     # (Kp, Np) pre-transposed, padded, compute-dtype weight
    bias: jax.Array   # (1, Np)  fp32 padded bias
    n: int            # true out_features
    k: int            # true in_features
    tn: int
    tk: int


def prepare_linear_params(weight, bias, *, compute_dtype: Optional[jnp.dtype] = jnp.bfloat16,
                          tn_max: int = 512, tk_max: int = 2048) -> LinearParams:
    """One-time weight/bias preparation (cast + transpose + pad), hoisted out of forward."""
    N, K = weight.shape
    tn, Np = _pick_tn(N, tn_max)
    tk, Kp = _pick_tk(K, tk_max)
    wt = weight.T                          # (K, N): kernel uses a plain jnp.dot, no
    if compute_dtype is not None:          # per-tile transpose stealing MXU issue slots
        wt = wt.astype(compute_dtype)
    wt = jnp.pad(wt, ((0, Kp - K), (0, Np - N)))
    b2 = jnp.pad(bias.astype(jnp.float32), (0, Np - N)).reshape(1, Np)
    return LinearParams(wt=wt, bias=b2, n=N, k=K, tn=tn, tk=tk)


def _make_linear_kernel(tn: int, use_scratch: bool):
    """Kernel factory.  Grid = (M tiles, N tiles, K tiles); K (reduction) innermost."""

    def kernel(x_ref, wt_ref, b_ref, o_ref, *scratch):
        k = pl.program_id(2)
        nk = pl.num_programs(2)
        j = pl.program_id(1)

        # (tm, tk) @ (tk, tn) -> (tm, tn), fp32 accumulate on the MXU.
        part = jnp.dot(x_ref[...], wt_ref[...], preferred_element_type=jnp.float32)

        def bias_tile():
            start = pl.multiple_of(j * tn, 128)
            return b_ref[:, pl.ds(start, tn)]          # (1, tn), broadcasts over tm

        if use_scratch:
            # Non-fp32 output: accumulate in fp32 scratch, single downcast at the end.
            acc_ref = scratch[0]

            @pl.when(k == 0)
            def _():
                acc_ref[...] = part

            @pl.when(k > 0)
            def _():
                acc_ref[...] += part

            @pl.when(k == nk - 1)
            def _():
                o_ref[...] = (acc_ref[...] + bias_tile()).astype(o_ref.dtype)
        else:
            # fp32 output: accumulate directly into the resident output block
            # (no scratch, no final (tm,tn) copy -> less vst pressure, esp. v5e).
            @pl.when(k == 0)
            def _():
                o_ref[...] = part

            @pl.when(k > 0)
            def _():
                o_ref[...] = o_ref[...] + part

            @pl.when(k == nk - 1)
            def _():
                o_ref[...] = o_ref[...] + bias_tile()

    return kernel


def linear_forward_prepared(x, params: LinearParams, *, tm: int = 256):
    """y = x @ W^T + b using pre-prepared parameters.  x: (B, in_features)."""
    M, K = x.shape
    assert K == params.k, "in_features mismatch"
    out_dtype = x.dtype
    Kp, Np = params.wt.shape
    tn, tk = params.tn, params.tk

    xc = x if x.dtype == params.wt.dtype else x.astype(params.wt.dtype)
    tm = min(tm, _round_up(M, 8))
    Mp = _round_up(M, tm)
    if (Mp, Kp) != (M, K):
        xc = jnp.pad(xc, ((0, Mp - M), (0, Kp - K)))   # zeros are safe for the reduction

    grid = (Mp // tm, Np // tn, Kp // tk)              # reduction axis (K) last

    fp32_direct = (out_dtype == jnp.float32)
    kernel = _make_linear_kernel(tn, use_scratch=not fp32_direct)
    scratch_shapes = [] if fp32_direct else [pltpu.VMEM((tm, tn), jnp.float32)]

    comp_isz = jnp.dtype(params.wt.dtype).itemsize
    out_isz = jnp.dtype(out_dtype).itemsize
    # Double-buffered x/W/out tiles + resident bias + optional scratch accumulator.
    vmem_est = (2 * tm * tk * comp_isz + 2 * tk * tn * comp_isz
                + 2 * tm * tn * out_isz + 2 * Np * 4
                + (0 if fp32_direct else tm * tn * 4))
    # 2x headroom, >= scoped default, <= 64 MiB so it is also safe on v7x.
    vmem_limit = int(min(max(2 * vmem_est, 32 * 1024 * 1024), 64 * 1024 * 1024))

    cost = pl.CostEstimate(
        flops=2 * Mp * Np * Kp,
        transcendentals=0,
        bytes_accessed=(Mp * Kp * comp_isz + Kp * Np * comp_isz
                        + Mp * Np * out_isz + Np * 4),
    )

    out = pl.pallas_call(
        kernel,
        out_shape=jax.ShapeDtypeStruct((Mp, Np), out_dtype),
        grid_spec=pltpu.PrefetchScalarGridSpec(
            num_scalar_prefetch=0,
            grid=grid,
            in_specs=[
                pl.BlockSpec((tm, tk), lambda i, j, k: (i, k)),   # x tile
                pl.BlockSpec((tk, tn), lambda i, j, k: (k, j)),   # W^T tile (K, N)
                pl.BlockSpec((1, Np), lambda i, j, k: (0, 0)),    # resident bias
            ],
            out_specs=pl.BlockSpec((tm, tn), lambda i, j, k: (i, j)),
            scratch_shapes=scratch_shapes,
        ),
        compiler_params=pltpu.CompilerParams(
            dimension_semantics=("parallel", "parallel", "arbitrary"),
            vmem_limit_bytes=vmem_limit,
        ),
        cost_estimate=cost,
    )(xc, params.wt, params.bias)

    if (Mp, Np) != (M, params.n):
        out = out[:M, :params.n]
    return out


def linear_forward(x, weight, bias, *, compute_dtype: Optional[jnp.dtype] = jnp.bfloat16,
                   tm: int = 256, tn_max: int = 512, tk_max: int = 2048):
    """Convenience one-shot wrapper: y = x @ weight.T + bias (torch.nn.Linear).

    For repeated calls with the same weights, call prepare_linear_params() once and
    reuse it with linear_forward_prepared() to avoid per-call weight cast/pad traffic.
    """
    params = prepare_linear_params(weight, bias, compute_dtype=compute_dtype,
                                   tn_max=tn_max, tk_max=tk_max)
    return linear_forward_prepared(x, params, tm=tm)


if __name__ == "__main__":
    key = jax.random.PRNGKey(0)

    def make_case(k, batch, in_features, out_features):
        kx, kw, kb = jax.random.split(k, 3)
        bound = 1.0 / jnp.sqrt(jnp.float32(in_features))
        weight = jax.random.uniform(
            kw, (out_features, in_features), jnp.float32, -bound, bound)
        bias = jax.random.uniform(kb, (out_features,), jnp.float32, -bound, bound)
        x = jax.random.normal(kx, (batch, in_features), jnp.float32)
        return x, weight, bias

    k1, k2 = jax.random.split(key)

    # Case 1: tiny module-scale shapes, exact fp32 path.
    x1, w1, b1 = make_case(k1, batch=8, in_features=32, out_features=16)
    y1 = jax.block_until_ready(linear_forward(x1, w1, b1, compute_dtype=None))
    y1_ref = x1 @ w1.T + b1
    assert y1.shape == y1_ref.shape
    assert jnp.allclose(y1, y1_ref, atol=1e-5, rtol=1e-5), "fp32 tiny mismatch"

    # Case 2: non-tile-aligned shapes; one-time param prep reused across calls
    # (bf16 MXU inputs -- the fast default -- with fp32 accumulate and fp32 bias).
    x2, w2, b2 = make_case(k2, batch=64, in_features=384, out_features=192)
    y2_ref = x2 @ w2.T + b2
    params_bf16 = prepare_linear_params(w2, b2)                 # default bf16
    y2 = jax.block_until_ready(linear_forward_prepared(x2, params_bf16))
    assert y2.shape == y2_ref.shape
    assert jnp.allclose(y2, y2_ref, atol=3e-2, rtol=3e-2), "bf16 default path mismatch"

    # Case 3: exact fp32 path with a forced multi-step K reduction (tk_max=128 -> 3 K
    # steps), exercising the in-place o_ref accumulation across the K grid axis.
    params_fp32 = prepare_linear_params(w2, b2, compute_dtype=None, tk_max=128)
    y3 = jax.block_until_ready(linear_forward_prepared(x2, params_fp32))
    assert jnp.allclose(y3, y2_ref, atol=1e-4, rtol=1e-4), "fp32 multi-K mismatch"

    # Case 4: bf16 activations/output -> fp32 scratch-accumulator path with a single
    # downcast at the last K step.
    y4 = jax.block_until_ready(
        linear_forward_prepared(x2.astype(jnp.bfloat16), params_bf16))
    assert y4.dtype == jnp.bfloat16
    assert jnp.allclose(y4.astype(jnp.float32), y2_ref, atol=5e-2, rtol=5e-2), \
        "bf16 output path mismatch"

    print("KERNEL_OK")
</pallas_src>

<mosaic_0001>
module attributes {stable_mosaic.version = 11 : i64} {
  func.func @kernel(%arg0: i32, %arg1: i32, %arg2: i32, %arg3: memref<8x128xf32, #tpu.memory_space<vmem>>, %arg4: memref<128x128xf32, #tpu.memory_space<vmem>>, %arg5: memref<1x128xf32, #tpu.memory_space<vmem>>, %arg6: memref<8x128xf32, #tpu.memory_space<vmem>>) attributes {dimension_semantics = [#tpu.dimension_semantics<parallel>, #tpu.dimension_semantics<parallel>, #tpu.dimension_semantics<arbitrary>], iteration_bounds = array<i64: 1, 1, 1>, scalar_prefetch = 0 : i64, scratch_operands = 0 : i64, tpu.core_type = #tpu.core_type<tc>, window_params = [{transform_indices = @transform_0, window_bounds = array<i64: 8, 128>}, {transform_indices = @transform_1, window_bounds = array<i64: 128, 128>}, {pipeline_mode = #tpu.pipeline_mode<synchronous>, transform_indices = @transform_2, window_bounds = array<i64: 1, 128>}, {transform_indices = @transform_3, window_bounds = array<i64: 8, 128>}]} {
    %c0 = arith.constant 0 : index
    %c0_0 = arith.constant 0 : index
    %0 = vector.load %arg3[%c0, %c0_0] : memref<8x128xf32, #tpu.memory_space<vmem>>, vector<8x128xf32>
    %c0_1 = arith.constant 0 : index
    %c0_2 = arith.constant 0 : index
    %1 = vector.load %arg4[%c0_1, %c0_2] : memref<128x128xf32, #tpu.memory_space<vmem>>, vector<128x128xf32>
    %cst = arith.constant dense<0.000000e+00> : vector<8x128xf32>
    %2 = tpu.matmul %0, %1, %cst {dimension_numbers = #tpu.dot_dimension_numbers<[1], [0], [0], [1], [0, 0, 1, 1], [], []>} : vector<8x128xf32>, vector<128x128xf32>, vector<8x128xf32> -> vector<8x128xf32>
    %c0_i32 = arith.constant 0 : i32
    %3 = arith.cmpi eq, %arg2, %c0_i32 : i32
    %4 = arith.extui %3 : i1 to i32
    %c0_i32_3 = arith.constant 0 : i32
    %5 = arith.cmpi ne, %4, %c0_i32_3 : i32
    scf.if %5 {
      %c0_8 = arith.constant 0 : index
      %c0_9 = arith.constant 0 : index
      %12 = vector.load %arg6[%c0_8, %c0_9] : memref<8x128xf32, #tpu.memory_space<vmem>>, vector<8x128xf32>
      tpu.vector_store %arg6[%c0_8, %c0_9], %2 {strides = array<i32>} : memref<8x128xf32, #tpu.memory_space<vmem>>, vector<8x128xf32>,
    } else {
    }
    %c0_i32_4 = arith.constant 0 : i32
    %6 = arith.cmpi sgt, %arg2, %c0_i32_4 : i32
    %7 = arith.extui %6 : i1 to i32
    %c0_i32_5 = arith.constant 0 : i32
    %8 = arith.cmpi ne, %7, %c0_i32_5 : i32
    scf.if %8 {
      %c0_8 = arith.constant 0 : index
      %c0_9 = arith.constant 0 : index
      %12 = vector.load %arg6[%c0_8, %c0_9] : memref<8x128xf32, #tpu.memory_space<vmem>>, vector<8x128xf32>
      %13 = arith.addf %12, %2 : vector<8x128xf32>
      %c0_10 = arith.constant 0 : index
      %c0_11 = arith.constant 0 : index
      %14 = vector.load %arg6[%c0_10, %c0_11] : memref<8x128xf32, #tpu.memory_space<vmem>>, vector<8x128xf32>
      tpu.vector_store %arg6[%c0_10, %c0_11], %13 {strides = array<i32>} : memref<8x128xf32, #tpu.memory_space<vmem>>, vector<8x128xf32>,
    } else {
    }
    %c0_i32_6 = arith.constant 0 : i32
    %9 = arith.cmpi eq, %arg2, %c0_i32_6 : i32
    %10 = arith.extui %9 : i1 to i32
    %c0_i32_7 = arith.constant 0 : i32
    %11 = arith.cmpi ne, %10, %c0_i32_7 : i32
    scf.if %11 {
      %c0_8 = arith.constant 0 : index
      %c0_9 = arith.constant 0 : index
      %12 = vector.load %arg6[%c0_8, %c0_9] : memref<8x128xf32, #tpu.memory_space<vmem>>, vector<8x128xf32>
      %c128_i32 = arith.constant 128 : i32
      %13 = arith.muli %arg1, %c128_i32 : i32
      %14 = tpu.assume_multiple %13, 128 : i32
      %c0_10 = arith.constant 0 : index
      %15 = arith.index_cast %14 : i32 to index
      %16 = vector.load %arg5[%c0_10, %15] : memref<1x128xf32, #tpu.memory_space<vmem>>, vector<1x128xf32>
      %17 = vector.broadcast %16 : vector<1x128xf32> to vector<8x128xf32>
      %18 = arith.addf %12, %17 : vector<8x128xf32>
      %c0_11 = arith.constant 0 : index
      %c0_12 = arith.constant 0 : index
      %19 = vector.load %arg6[%c0_11, %c0_12] : memref<8x128xf32, #tpu.memory_space<vmem>>, vector<8x128xf32>
      tpu.vector_store %arg6[%c0_11, %c0_12], %18 {strides = array<i32>} : memref<8x128xf32, #tpu.memory_space<vmem>>, vector<8x128xf32>,
    } else {
    }
    return
  }
  func.func @transform_0(%arg0: i32, %arg1: i32, %arg2: i32) -> (i32, i32) {
    %c0_i32 = arith.constant 0 : i32
    return %arg0, %arg2 : i32, i32
  }
  func.func @transform_1(%arg0: i32, %arg1: i32, %arg2: i32) -> (i32, i32) {
    %c0_i32 = arith.constant 0 : i32
    return %arg2, %arg1 : i32, i32
  }
  func.func @transform_2(%arg0: i32, %arg1: i32, %arg2: i32) -> (i32, i32) {
    %c0_i32 = arith.constant 0 : i32
    %c0_i32_0 = arith.constant 0 : i32
    %c0_i32_1 = arith.constant 0 : i32
    return %c0_i32, %c0_i32_0 : i32, i32
  }
  func.func @transform_3(%arg0: i32, %arg1: i32, %arg2: i32) -> (i32, i32) {
    %c0_i32 = arith.constant 0 : i32
    return %arg0, %arg1 : i32, i32
  }
}

</mosaic_0001>

<bundles_post_ra>
// kernel: tpu_custom_call.1
= control target key start
LH: loop header
LB: loop body
LE: loop exit
PB: predicated region body
PF: predicated region fallthrough
CT: control target
= control target key end

     0   :  { %8 = vsyncpa [#allocation3], 0  ;;  %s339_s0 = inlined_call_operand.hbm [shape: f32[8,128], index: 0, kind: input, shape index: {}]   ;;  %s340_s1 = inlined_call_operand.hbm [shape: f32[128,128], index: 1, kind: input, shape index: {}]   ;;  %s341_s2 = inlined_call_operand.vmem [shape: f32[1,128], index: 2, kind: input, shape index: {}]   ;;  %s342_s3 = inlined_call_operand.hbm [shape: f32[8,128], index: 3, kind: output, shape index: {}]  }
   0x1   :  { %9 = vsyncpa [#allocation6], 0 }
   0x2   :  { %10 = vsyncpa [#allocation4], 0  ;;  %s300_s12 = smov [#allocation2]   ;;  %s301_s14 = smov [#allocation5]  }
   0x3   :  { %s17_s13 = sshll.u32 %s300_s12, 4  ;;  %s26_s15 = sshll.u32 %s301_s14, 4  ;;  %s18_s13 = int_to_ptr.vmem [resolvable:$true] %s17_s13  ;;  %s27_s15 = int_to_ptr.vmem [resolvable:$true] %s26_s15 }
   0x4   :  { %s242_s16 = scalar_lea.vmem %s18_s13, 128  ;;  %p247_p1 = scmp.lt.s32.totalorder %s18_s13, %s18_s13 }
   0x5   :  { %p243_p0 = scmp.ne.s32.totalorder %s18_s13, %s242_s16  ;;  %p248_p2 = scmp.lt.s32.totalorder %s242_s16, %s242_s16 }
   0x7   :  { %p249_p3 = por %p248_p2, %p247_p1 }
   0x9   :  { %p250_p4 = pnand %p249_p3, %p243_p0 }
   0xb   :  { %253 = shalt.err (!%p250_p4)
}
   0xc   :  { %20 = dma.hbm_to_vmem [thread:$0]  %s339_s0, 128, %s18_s13, [#allocation3]  }
   0xd   :  { %s262_s19 = scalar_lea.vmem %s27_s15, 2048  ;;  %p267_p6 = scmp.lt.s32.totalorder %s27_s15, %s27_s15 }
   0xe   :  { %p263_p5 = scmp.ne.s32.totalorder %s27_s15, %s262_s19  ;;  %p268_p7 = scmp.lt.s32.totalorder %s262_s19, %s262_s19 }
  0x10   :  { %p269_p8 = por %p268_p7, %p267_p6 }
  0x12   :  { %p270_p9 = pnand %p269_p8, %p263_p5 }
  0x14   :  { %273 = shalt.err (!%p270_p9)
}
  0x15   :  { %s302_s20 = smov 128   ;;  %s303_s21 = smov 8  }
  0x16   :  { %32 = dma.hbm_to_vmem [thread:$0]  %s340_s1, 2048, %s27_s15, [#allocation6], %s302_s20, %s302_s20, %s303_s21  }
  0x17   :  { %294 = dma.done.wait [#allocation3], 128  }
  0x18   :  { %295 = vsyncadd [#allocation3], 4294967168 }
  0x19   :  { %296 = dma.done.wait [#allocation6], 2048  }
  0x1a   :  { %297 = vsyncadd [#allocation6], 4294965248  ;;  %v304_v0 = vmov 0.0   ;;  %vm305_vm0 = vmmov 0   ;;  %v57_v1 = vld [vmem:[#allocation5 + $0x78] sm:$0xff]  ;;  %v56_v2 = vld [vmem:[#allocation5 + $0x70] sm:$0xff] }
  0x1b   :  { %192 = vmatprep.subr.mxu0 %v304_v0  ;;  %224 = vmatprep.mubr.msk.f32.mxu0 %vm305_vm0, %v304_v0  ;;  %v55_v3 = vld [vmem:[#allocation5 + $0x68] sm:$0xff]  ;;  %v54_v4 = vld [vmem:[#allocation5 + $0x60] sm:$0xff]  ;;  %v53_v5 = vld [vmem:[#allocation5 + $0x58] sm:$0xff]  ;;  %s306_s24 = smov [#allocation7]  }
  0x1c   :  { %193 = vmatpush3.msra.mxu0 %v57_v1  ;;  %v52_v6 = vld [vmem:[#allocation5 + $0x50] sm:$0xff]  ;;  %v51_v7 = vld [vmem:[#allocation5 + $0x48] sm:$0xff]  ;;  %v50_v8 = vld [vmem:[#allocation5 + $0x40] sm:$0xff]  ;;  %s163_s25 = sshll.u32 %s306_s24, 4  ;;  %s164_s25 = int_to_ptr.vmem [resolvable:$true] %s163_s25 }
  0x1d   :  { %194 = vmatprep.subr.mxu0 %v304_v0  ;;  %v49_v9 = vld [vmem:[#allocation5 + $0x38] sm:$0xff]  ;;  %v48_v10 = vld [vmem:[#allocation5 + $0x30] sm:$0xff]  ;;  %v47_v11 = vld [vmem:[#allocation5 + $0x28] sm:$0xff]  ;;  %s274_s26 = scalar_lea.vmem %s164_s25, 128  ;;  %p279_p11 = scmp.lt.s32.totalorder %s164_s25, %s164_s25 }
  0x1e   :  { %195 = vmatpush3.msra.mxu0 %v56_v2  ;;  %v46_v12 = vld [vmem:[#allocation5 + $0x20] sm:$0xff]  ;;  %v45_v13 = vld [vmem:[#allocation5 + $0x18] sm:$0xff]  ;;  %v44_v14 = vld [vmem:[#allocation5 + $0x10] sm:$0xff]  ;;  %p275_p10 = scmp.ne.s32.totalorder %s164_s25, %s274_s26  ;;  %p280_p12 = scmp.lt.s32.totalorder %s274_s26, %s274_s26 }
  0x1f   :  { %196 = vmatprep.subr.mxu0 %v304_v0  ;;  %v43_v15 = vld [vmem:[#allocation5 + $0x8] sm:$0xff]  ;;  %v42_v16 = vld [vmem:[#allocation5] sm:$0xff]  ;;  %v41_v17 = vld [vmem:[#allocation2] sm:$0xff] }
  0x20   :  { %197 = vmatpush3.msra.mxu0 %v55_v3  ;;  %v174_v18 = vld [vmem:[%s341_s2] ss:$0 sm:$0xff]  ;;  %p281_p13 = por %p280_p12, %p279_p11 }
  0x21   :  { %198 = vmatprep.subr.mxu0 %v304_v0 }
  0x22   :  { %199 = vmatpush3.msra.mxu0 %v54_v4  ;;  %p282_p0 = pnand %p281_p13, %p275_p10 }
  0x23   :  { %200 = vmatprep.subr.mxu0 %v304_v0 }
  0x24   :  { %201 = vmatpush3.msra.mxu0 %v53_v5 }
  0x25   :  { %202 = vmatprep.subr.mxu0 %v304_v0 }
  0x26   :  { %203 = vmatpush3.msra.mxu0 %v52_v6 }
  0x27   :  { %204 = vmatprep.subr.mxu0 %v304_v0 }
  0x28   :  { %205 = vmatpush3.msra.mxu0 %v51_v7 }
  0x29   :  { %206 = vmatprep.subr.mxu0 %v304_v0 }
  0x2a   :  { %207 = vmatpush3.msra.mxu0 %v50_v8 }
  0x2b   :  { %208 = vmatprep.subr.mxu0 %v304_v0 }
  0x2c   :  { %209 = vmatpush3.msra.mxu0 %v49_v9 }
  0x2d   :  { %210 = vmatprep.subr.mxu0 %v304_v0 }
  0x2e   :  { %211 = vmatpush3.msra.mxu0 %v48_v10 }
  0x2f   :  { %212 = vmatprep.subr.mxu0 %v304_v0 }
  0x30   :  { %213 = vmatpush3.msra.mxu0 %v47_v11 }
  0x31   :  { %214 = vmatprep.subr.mxu0 %v304_v0 }
  0x32   :  { %215 = vmatpush3.msra.mxu0 %v46_v12 }
  0x33   :  { %216 = vmatprep.subr.mxu0 %v304_v0 }
  0x34   :  { %217 = vmatpush3.msra.mxu0 %v45_v13 }
  0x35   :  { %218 = vmatprep.subr.mxu0 %v304_v0 }
  0x36   :  { %219 = vmatpush3.msra.mxu0 %v44_v14 }
  0x37   :  { %220 = vmatprep.subr.mxu0 %v304_v0 }
  0x38   :  { %221 = vmatpush3.msra.mxu0 %v43_v15 }
  0x39   :  { %222 = vmatprep.subr.mxu0 %v304_v0 }
  0x3a   :  { %223 = vmatpush3.msra.mxu0 %v42_v16 }
  0x3b   :  { %225 = vmatmul.mubr.f32.vlgmr.msra.gmra.mxu0 %v41_v17 }
  0xfb   :  { %v124_v19 = vpop.f32.mrf.mxu0 }
  0xfc   :  { %v155_v20 = vadd.f32 %v174_v18, %v124_v19 }
  0xfd   :  { %v226_v21 = vpop.f32.mrf.mxu0 }
  0xfe   :  { %156 = vst [vmem:[#allocation7] sm:$0xff] %v155_v20 }
  0xff   :  { %285 = shalt.err (!%p282_p0)
}
 0x100   :  { %166 = dma.vmem_to_hbm [thread:$0]  %s164_s25, 128, %s342_s3, [#allocation4]  }
 0x101   :  { %298 = dma.done.wait [#allocation4], 128  }
 0x102   :  { %299 = vsyncadd [#allocation4], 4294967168 }
 0x103   :  { %170 = vsyncpa [#allocation3], 1 }
 0x104   :  { %171 = vsyncpa [#allocation6], 1 }
 0x105   :  { %172 = vsyncpa [#allocation4], 1 }

</bundles_post_ra>
